<compile_context>
chip_gen: v7x
topology: tpu7x:2x2x1
jax: 0.10.0
libtpu: 0.0.40
codegen_flags: <defaults>
</compile_context>

<pallas_src>
import functools

import jax
import jax.numpy as jnp
from jax.experimental import pallas as pl
from jax.experimental.pallas import tpu as pltpu


def _round_up(x, m):
    return ((x + m - 1) // m) * m


def encoder_kernel(adj_ref, feats_ref, self_ref, w_self_ref, w_neigh_ref,
                   out_ref, neigh_acc, *, feat_dim):
    # Grid: (N tiles [parallel], M tiles [arbitrary = reduction]).
    # adj_ref:     (TN, TM)       int8  raw 0/1 adjacency tile
    # feats_ref:   (TM, F_pad)    bf16  feature tile; column `feat_dim` is all-ones
    # self_ref:    (TN, F_pad)    bf16  self features (gathered in wrapper)
    # w_self_ref:  (E_pad, F_pad) bf16  weight[:, :F], zero-padded
    # w_neigh_ref: (E_pad, F_pad) bf16  weight[:, F:], zero-padded
    # out_ref:     (E_pad, TN)    f32   lane-dense output block (resident over M)
    # neigh_acc:   (TN, F_pad)    f32   running [neighbor-sum | degree] accumulator
    k = pl.program_id(1)

    @pl.when(k == 0)
    def _init():
        neigh_acc[...] = jnp.zeros_like(neigh_acc)
        # Self projection has no dependence on the M reduction: do it on the
        # first step (hidden behind the streaming DMAs) and stash it in the
        # resident output block instead of the serial epilogue.
        out_ref[...] = jax.lax.dot_general(
            w_self_ref[...], self_ref[...],
            dimension_numbers=(((1,), (1,)), ((), ())),
            preferred_element_type=jnp.float32)

    # int8 {0,1} adjacency -> bf16 right before the MXU (VPU cast is free in a
    # mem-bound regime; the HBM stream is half the size).
    adj = adj_ref[...].astype(jnp.bfloat16)                       # (TN, TM)
    # (TN, TM) x (TM, F_pad) -> (TN, F_pad).  Column `feat_dim` of the feature
    # tile is all-ones, so the row degree accumulates as a by-product of the
    # same matmul (no separate cast / cross-lane reduce / degree scratch).
    neigh_acc[...] += jax.lax.dot_general(
        adj, feats_ref[...],
        dimension_numbers=(((1,), (0,)), ((), ())),
        preferred_element_type=jnp.float32)

    @pl.when(k == pl.num_programs(1) - 1)
    def _finalize():
        acc = neigh_acc[...]                                      # (TN, F_pad)
        deg = acc[:, feat_dim:feat_dim + 1]                       # (TN, 1)
        inv_deg = pl.reciprocal(jnp.maximum(deg, 1.0), approx=False)
        neigh = (acc * inv_deg).astype(jnp.bfloat16)              # (TN, F_pad)
        # Columns >= F of W_neigh are zero-padded, so the (scaled) degree
        # column and the zero padding contribute nothing.
        out = out_ref[...] + jax.lax.dot_general(
            w_neigh_ref[...], neigh,
            dimension_numbers=(((1,), (1,)), ((), ())),
            preferred_element_type=jnp.float32)
        out_ref[...] = jnp.maximum(out, 0.0)                      # fused ReLU


def encoder_forward(nodes, features, adj_matrix, weight, *, m_tile=512, n_tile=256):
    """nodes: (N,) int32; features: (M, F); adj_matrix: (M, M) {0,1};
    weight: (E, 2F).  Returns (E, N) float32."""
    M, F = features.shape
    E = weight.shape[0]
    N = nodes.shape[0]

    # Padded / tiled sizes: lane-dense output (N tiles of 128+), 128-aligned E
    # and F for the projection matmuls, 128-aligned M tiles for the reduction.
    TN = min(n_tile, _round_up(max(N, 1), 128))
    N_pad = _round_up(max(N, 1), TN)
    E_pad = _round_up(max(E, 1), 128)
    F_pad = _round_up(F + 1, 128)          # +1 lane for the all-ones degree column
    TM = min(m_tile, _round_up(max(M, 1), 128))
    M_pad = _round_up(max(M, 1), TM)

    # Wrapper glue: row gathers only; adjacency stays int8 {0,1} in HBM.
    # TODO(synk): pull these gathers into the kernel with
    # PrefetchScalarGridSpec(num_scalar_prefetch=1) + pl.Element index maps so
    # the (N, M) adjacency slab is not re-written by the gather/pad passes.
    adj_rows = adj_matrix[nodes].astype(jnp.int8)                  # (N, M) 0/1
    self_feats = features[nodes].astype(jnp.bfloat16)              # (N, F)

    feats_aug = jnp.concatenate(
        [features.astype(jnp.bfloat16),
         jnp.ones((M, 1), dtype=jnp.bfloat16)], axis=1)            # (M, F+1)

    adj_p = jnp.pad(adj_rows, ((0, N_pad - N), (0, M_pad - M)))
    feats_p = jnp.pad(feats_aug, ((0, M_pad - M), (0, F_pad - (F + 1))))
    self_p = jnp.pad(self_feats, ((0, N_pad - N), (0, F_pad - F)))
    w_self = jnp.pad(weight[:, :F].astype(jnp.bfloat16),
                     ((0, E_pad - E), (0, F_pad - F)))
    w_neigh = jnp.pad(weight[:, F:].astype(jnp.bfloat16),
                      ((0, E_pad - E), (0, F_pad - F)))

    grid = (N_pad // TN, M_pad // TM)

    # VMEM budget from the actual tile arithmetic.
    # TODO(synk): mark the grid-invariant operands (self, W_self, W_neigh) with
    # pipeline_mode=pl.Buffered(1) to drop their second buffer once that path
    # is validated on all target chips.
    tile_bytes = (
        2 * (TN * TM * 1)              # adjacency tile (int8), double-buffered
        + 2 * (TM * F_pad * 2)         # feature tile (bf16), double-buffered
        + 2 * (TN * F_pad * 2)         # self feats (bf16)
        + 2 * 2 * (E_pad * F_pad * 2)  # W_self + W_neigh (bf16)
        + 2 * (E_pad * TN * 4)         # output block (f32), double-buffered
        + TN * F_pad * 4               # neighbor-sum/degree accumulator (f32)
    )
    try:
        vmem_cap = int(pltpu.get_tpu_info().vmem_capacity_bytes)
    except Exception:
        vmem_cap = 64 << 20            # conservative fallback (v7x per-TC VMEM)
    vmem_limit = int(min(max(2 * tile_bytes, 16 << 20), int(0.75 * vmem_cap)))

    out_full = pl.pallas_call(
        functools.partial(encoder_kernel, feat_dim=F),
        out_shape=jax.ShapeDtypeStruct((E_pad, N_pad), jnp.float32),
        grid=grid,
        in_specs=[
            pl.BlockSpec((TN, TM), lambda n, k: (n, k)),        # adjacency (int8)
            pl.BlockSpec((TM, F_pad), lambda n, k: (k, 0)),     # feature tile
            pl.BlockSpec((TN, F_pad), lambda n, k: (n, 0)),     # self feats
            pl.BlockSpec((E_pad, F_pad), lambda n, k: (0, 0)),  # W_self
            pl.BlockSpec((E_pad, F_pad), lambda n, k: (0, 0)),  # W_neigh
        ],
        out_specs=pl.BlockSpec((E_pad, TN), lambda n, k: (0, n)),
        scratch_shapes=[
            pltpu.VMEM((TN, F_pad), jnp.float32),   # [neigh-sum | degree] accumulator
        ],
        compiler_params=pltpu.CompilerParams(
            dimension_semantics=("parallel", "arbitrary"),   # N parallel, M = reduction
            vmem_limit_bytes=vmem_limit),
    )(adj_p, feats_p, self_p, w_self, w_neigh)

    return out_full[:E, :N]


if __name__ == "__main__":
    key = jax.random.PRNGKey(0)
    k_feat, k_adj, k_w, k_nodes = jax.random.split(key, 4)

    num_total_nodes = 16   # M
    feat_dim = 32          # F
    embed_dim = 16         # E
    batch_nodes = 8        # N

    # Deterministic feature table.
    features = jax.random.normal(k_feat, (num_total_nodes, feat_dim), dtype=jnp.float32)

    # Deterministic symmetric 0/1 adjacency, zero diagonal, guaranteed degree >= 1.
    a = (jax.random.uniform(k_adj, (num_total_nodes, num_total_nodes)) < 0.3).astype(jnp.int32)
    adj = jnp.clip(a + a.T, 0, 1)
    adj = adj * (1 - jnp.eye(num_total_nodes, dtype=jnp.int32))
    ring = jnp.roll(jnp.eye(num_total_nodes, dtype=jnp.int32), 1, axis=1)
    adj = jnp.clip(adj + ring + ring.T, 0, 1)                    # ensure connectivity

    # Xavier-uniform weight, shape (embed_dim, 2 * feat_dim)  (gcn=False path).
    fan_in, fan_out = 2 * feat_dim, embed_dim
    limit = (6.0 / (fan_in + fan_out)) ** 0.5
    weight = jax.random.uniform(k_w, (embed_dim, 2 * feat_dim),
                                minval=-limit, maxval=limit, dtype=jnp.float32)

    nodes = jax.random.randint(k_nodes, (batch_nodes,), 0, num_total_nodes, dtype=jnp.int32)

    out = encoder_forward(nodes, features, adj, weight)
    out = jax.block_until_ready(out)
    assert out.shape == (embed_dim, batch_nodes)

    # Reference in plain JAX with the same bf16 input quantization the kernel
    # uses (f32 accumulation), so the check stays tight.
    f_b = features.astype(jnp.bfloat16).astype(jnp.float32)
    w_b = weight.astype(jnp.bfloat16).astype(jnp.float32)
    self_b = f_b[nodes]
    adj_rows = adj[nodes].astype(jnp.float32)
    deg = jnp.maximum(adj_rows.sum(axis=1, keepdims=True), 1.0)
    neigh = (adj_rows @ f_b) / deg
    neigh_b = neigh.astype(jnp.bfloat16).astype(jnp.float32)
    combined = jnp.concatenate([self_b, neigh_b], axis=1)
    ref = jnp.maximum(w_b @ combined.T, 0.0)
    assert jnp.allclose(out, ref, atol=2e-2, rtol=2e-2), (
        float(jnp.max(jnp.abs(out - ref))))

    # Sanity check against the exact f32 math as well (looser, bf16-level).
    self_f = features[nodes]
    neigh_f = (adj_rows / deg) @ features
    ref_f32 = jnp.maximum(weight @ jnp.concatenate([self_f, neigh_f], axis=1).T, 0.0)
    assert jnp.allclose(out, ref_f32, atol=1e-1, rtol=1e-1)

    print("KERNEL_OK")
</pallas_src>

<mosaic_0001>
module attributes {stable_mosaic.version = 11 : i64} {
  func.func @encoder_kernel(%arg0: i32, %arg1: i32, %arg2: memref<128x128xi8, #tpu.memory_space<vmem>>, %arg3: memref<128x128xbf16, #tpu.memory_space<vmem>>, %arg4: memref<128x128xbf16, #tpu.memory_space<vmem>>, %arg5: memref<128x128xbf16, #tpu.memory_space<vmem>>, %arg6: memref<128x128xbf16, #tpu.memory_space<vmem>>, %arg7: memref<128x128xf32, #tpu.memory_space<vmem>>, %arg8: memref<128x128xf32, #tpu.memory_space<vmem>>) attributes {dimension_semantics = [#tpu.dimension_semantics<parallel>, #tpu.dimension_semantics<arbitrary>], iteration_bounds = array<i64: 1, 1>, scalar_prefetch = 0 : i64, scratch_operands = 1 : i64, tpu.core_type = #tpu.core_type<tc>, window_params = [{transform_indices = @transform_0, window_bounds = array<i64: 128, 128>}, {transform_indices = @transform_1, window_bounds = array<i64: 128, 128>}, {transform_indices = @transform_2, window_bounds = array<i64: 128, 128>}, {pipeline_mode = #tpu.pipeline_mode<synchronous>, transform_indices = @transform_3, window_bounds = array<i64: 128, 128>}, {pipeline_mode = #tpu.pipeline_mode<synchronous>, transform_indices = @transform_4, window_bounds = array<i64: 128, 128>}, {transform_indices = @transform_5, window_bounds = array<i64: 128, 128>}]} {
    %c0_i32 = arith.constant 0 : i32
    %0 = arith.cmpi eq, %arg1, %c0_i32 : i32
    %1 = arith.extui %0 : i1 to i32
    %c0_i32_0 = arith.constant 0 : i32
    %2 = arith.cmpi ne, %1, %c0_i32_0 : i32
    scf.if %2 {
      %cst_10 = arith.constant 0.000000e+00 : f32
      %13 = vector.broadcast %cst_10 : f32 to vector<128x128xf32>
      %c0_11 = arith.constant 0 : index
      %c0_12 = arith.constant 0 : index
      %14 = vector.load %arg8[%c0_11, %c0_12] : memref<128x128xf32, #tpu.memory_space<vmem>>, vector<128x128xf32>
      tpu.vector_store %arg8[%c0_11, %c0_12], %13 {strides = array<i32>} : memref<128x128xf32, #tpu.memory_space<vmem>>, vector<128x128xf32>,
      %c0_13 = arith.constant 0 : index
      %c0_14 = arith.constant 0 : index
      %15 = vector.load %arg5[%c0_13, %c0_14] : memref<128x128xbf16, #tpu.memory_space<vmem>>, vector<128x128xbf16>
      %c0_15 = arith.constant 0 : index
      %c0_16 = arith.constant 0 : index
      %16 = vector.load %arg4[%c0_15, %c0_16] : memref<128x128xbf16, #tpu.memory_space<vmem>>, vector<128x128xbf16>
      %cst_17 = arith.constant dense<0.000000e+00> : vector<128x128xf32>
      %17 = tpu.matmul %15, %16, %cst_17 {dimension_numbers = #tpu.dot_dimension_numbers<[1], [1], [0], [0], [0, 0, 1, 0], [], []>} : vector<128x128xbf16>, vector<128x128xbf16>, vector<128x128xf32> -> vector<128x128xf32>
      %c0_18 = arith.constant 0 : index
      %c0_19 = arith.constant 0 : index
      %18 = vector.load %arg7[%c0_18, %c0_19] : memref<128x128xf32, #tpu.memory_space<vmem>>, vector<128x128xf32>
      tpu.vector_store %arg7[%c0_18, %c0_19], %17 {strides = array<i32>} : memref<128x128xf32, #tpu.memory_space<vmem>>, vector<128x128xf32>,
    } else {
    }
    %c0 = arith.constant 0 : index
    %c0_1 = arith.constant 0 : index
    %3 = vector.load %arg2[%c0, %c0_1] : memref<128x128xi8, #tpu.memory_space<vmem>>, vector<128x128xi8>
    %4 = arith.sitofp %3 : vector<128x128xi8> to vector<128x128xbf16>
    %c0_2 = arith.constant 0 : index
    %c0_3 = arith.constant 0 : index
    %5 = vector.load %arg8[%c0_2, %c0_3] : memref<128x128xf32, #tpu.memory_space<vmem>>, vector<128x128xf32>
    %c0_4 = arith.constant 0 : index
    %c0_5 = arith.constant 0 : index
    %6 = vector.load %arg3[%c0_4, %c0_5] : memref<128x128xbf16, #tpu.memory_space<vmem>>, vector<128x128xbf16>
    %cst = arith.constant dense<0.000000e+00> : vector<128x128xf32>
    %7 = tpu.matmul %4, %6, %cst {dimension_numbers = #tpu.dot_dimension_numbers<[1], [0], [0], [1], [0, 0, 1, 1], [], []>} : vector<128x128xbf16>, vector<128x128xbf16>, vector<128x128xf32> -> vector<128x128xf32>
    %8 = arith.addf %5, %7 : vector<128x128xf32>
    %c0_6 = arith.constant 0 : index
    %c0_7 = arith.constant 0 : index
    %9 = vector.load %arg8[%c0_6, %c0_7] : memref<128x128xf32, #tpu.memory_space<vmem>>, vector<128x128xf32>
    tpu.vector_store %arg8[%c0_6, %c0_7], %8 {strides = array<i32>} : memref<128x128xf32, #tpu.memory_space<vmem>>, vector<128x128xf32>,
    %c0_i32_8 = arith.constant 0 : i32
    %10 = arith.cmpi eq, %arg1, %c0_i32_8 : i32
    %11 = arith.extui %10 : i1 to i32
    %c0_i32_9 = arith.constant 0 : i32
    %12 = arith.cmpi ne, %11, %c0_i32_9 : i32
    scf.if %12 {
      %c0_10 = arith.constant 0 : index
      %c0_11 = arith.constant 0 : index
      %13 = vector.load %arg8[%c0_10, %c0_11] : memref<128x128xf32, #tpu.memory_space<vmem>>, vector<128x128xf32>
      %14 = vector.extract_strided_slice %13 {offsets = [0, 32], sizes = [128, 1], strides = [1, 1]} : vector<128x128xf32> to vector<128x1xf32>
      %cst_12 = arith.constant 1.000000e+00 : f32
      %15 = vector.broadcast %cst_12 : f32 to vector<128x1xf32>
      %16 = arith.maximumf %14, %15 : vector<128x1xf32>
      %17 = tpu.reciprocal %16 : vector<128x1xf32> -> vector<128x1xf32>
      %18 = vector.broadcast %17 : vector<128x1xf32> to vector<128x128xf32>
      %19 = arith.mulf %13, %18 : vector<128x128xf32>
      %20 = arith.truncf %19 : vector<128x128xf32> to vector<128x128xbf16>
      %c0_13 = arith.constant 0 : index
      %c0_14 = arith.constant 0 : index
      %21 = vector.load %arg7[%c0_13, %c0_14] : memref<128x128xf32, #tpu.memory_space<vmem>>, vector<128x128xf32>
      %c0_15 = arith.constant 0 : index
      %c0_16 = arith.constant 0 : index
      %22 = vector.load %arg6[%c0_15, %c0_16] : memref<128x128xbf16, #tpu.memory_space<vmem>>, vector<128x128xbf16>
      %cst_17 = arith.constant dense<0.000000e+00> : vector<128x128xf32>
      %23 = tpu.matmul %22, %20, %cst_17 {dimension_numbers = #tpu.dot_dimension_numbers<[1], [1], [0], [0], [0, 0, 1, 0], [], []>} : vector<128x128xbf16>, vector<128x128xbf16>, vector<128x128xf32> -> vector<128x128xf32>
      %24 = arith.addf %21, %23 : vector<128x128xf32>
      %cst_18 = arith.constant 0.000000e+00 : f32
      %25 = vector.broadcast %cst_18 : f32 to vector<128x128xf32>
      %26 = arith.maximumf %24, %25 : vector<128x128xf32>
      %c0_19 = arith.constant 0 : index
      %c0_20 = arith.constant 0 : index
      %27 = vector.load %arg7[%c0_19, %c0_20] : memref<128x128xf32, #tpu.memory_space<vmem>>, vector<128x128xf32>
      tpu.vector_store %arg7[%c0_19, %c0_20], %26 {strides = array<i32>} : memref<128x128xf32, #tpu.memory_space<vmem>>, vector<128x128xf32>,
    } else {
    }
    return
  }
  func.func @transform_0(%arg0: i32, %arg1: i32) -> (i32, i32) {
    %c0_i32 = arith.constant 0 : i32
    return %arg0, %arg1 : i32, i32
  }
  func.func @transform_1(%arg0: i32, %arg1: i32) -> (i32, i32) {
    %c0_i32 = arith.constant 0 : i32
    %c0_i32_0 = arith.constant 0 : i32
    return %arg1, %c0_i32 : i32, i32
  }
  func.func @transform_2(%arg0: i32, %arg1: i32) -> (i32, i32) {
    %c0_i32 = arith.constant 0 : i32
    %c0_i32_0 = arith.constant 0 : i32
    return %arg0, %c0_i32 : i32, i32
  }
  func.func @transform_3(%arg0: i32, %arg1: i32) -> (i32, i32) {
    %c0_i32 = arith.constant 0 : i32
    %c0_i32_0 = arith.constant 0 : i32
    %c0_i32_1 = arith.constant 0 : i32
    return %c0_i32, %c0_i32_0 : i32, i32
  }
  func.func @transform_4(%arg0: i32, %arg1: i32) -> (i32, i32) {
    %c0_i32 = arith.constant 0 : i32
    %c0_i32_0 = arith.constant 0 : i32
    %c0_i32_1 = arith.constant 0 : i32
    return %c0_i32, %c0_i32_0 : i32, i32
  }
  func.func @transform_5(%arg0: i32, %arg1: i32) -> (i32, i32) {
    %c0_i32 = arith.constant 0 : i32
    %c0_i32_0 = arith.constant 0 : i32
    return %c0_i32, %arg0 : i32, i32
  }
}

</mosaic_0001>

<bundles_post_ra>
// kernel: tpu_custom_call.1
= control target key start
LH: loop header
LB: loop body
LE: loop exit
PB: predicated region body
PF: predicated region fallthrough
CT: control target
= control target key end

     0   :  { %10 = vsyncpa [#allocation4], 0  ;;  %s1655_s0 = inlined_call_operand.hbm [shape: s8[128,128], index: 0, kind: input, shape index: {}]   ;;  %s1656_s1 = inlined_call_operand.hbm [shape: bf16[128,128], index: 1, kind: input, shape index: {}]   ;;  %s1657_s2 = inlined_call_operand.hbm [shape: bf16[128,128], index: 2, kind: input, shape index: {}]   ;;  %s1658_s3 = inlined_call_operand.hbm [shape: bf16[128,128], index: 3, kind: input, shape index: {}]   ;;  %s1659_s4 = inlined_call_operand.hbm [shape: bf16[128,128], index: 4, kind: input, shape index: {}]   ;;  %s1660_s5 = inlined_call_operand.hbm [shape: f32[128,128], index: 5, kind: output, shape index: {}]  }
   0x1   :  { %11 = vsyncpa [#allocation7], 0 }
   0x2   :  { %12 = vsyncpa [#allocation10], 0 }
   0x3   :  { %13 = vsyncpa [#allocation5], 0  ;;  %s1412_s18 = smov [#allocation6]   ;;  %s1272_s22 = scalar_lea.hbm %s1656_s1, 1024 }
   0x4   :  { %s31_s19 = sshll.u32 %s1412_s18, 4  ;;  %p1273_p0 = scmp.ne.s32.totalorder %s1656_s1, %s1272_s22  ;;  %s32_s19 = int_to_ptr.vmem [resolvable:$true] %s31_s19 }
   0x5   :  { %p1276_p1 = scmp.lt.u32.totalorder %s1272_s22, %s1656_s1 }
   0x7   :  { %p1278_p2 = pnand %p1276_p1, %p1273_p0 }
   0x9   :  { %1281 = shalt.err (!%p1278_p2)
}
   0xa   :  { %s1282_s27 = scalar_lea.vmem %s32_s19, 1024  ;;  %p1287_p4 = scmp.lt.s32.totalorder %s32_s19, %s32_s19 }
   0xb   :  { %p1283_p3 = scmp.ne.s32.totalorder %s32_s19, %s1282_s27  ;;  %p1288_p5 = scmp.lt.s32.totalorder %s1282_s27, %s1282_s27 }
   0xd   :  { %p1289_p6 = por %p1288_p5, %p1287_p4 }
   0xf   :  { %p1290_p7 = pnand %p1289_p6, %p1283_p3 }
  0x11   :  { %1293 = shalt.err (!%p1290_p7)
}
  0x12   :  { %s1413_s28 = smov 64   ;;  %s1414_s29 = smov 4  }
  0x13   :  { %37 = dma.hbm_to_vmem [thread:$0]  %s1656_s1, 1024, %s32_s19, [#allocation7], %s1413_s28, %s1413_s28, %s1414_s29  }
  0x14   :  { %s1415_s7 = smov [#allocation9]   ;;  %s1416_s9 = smov [#allocation3]  }
  0x15   :  { %s55_s8 = sshll.u32 %s1415_s7, 4  ;;  %s19_s10 = sshll.u32 %s1416_s9, 4  ;;  %s56_s8 = int_to_ptr.vmem [resolvable:$true] %s55_s8  ;;  %s20_s10 = int_to_ptr.vmem [resolvable:$true] %s19_s10 }
  0x16   :  { %s1294_s13 = scalar_lea.hbm %s1658_s3, 1024 }
  0x17   :  { %p1295_p8 = scmp.ne.s32.totalorder %s1658_s3, %s1294_s13  ;;  %p1298_p9 = scmp.lt.u32.totalorder %s1294_s13, %s1658_s3 }
  0x19   :  { %p1300_p10 = pnand %p1298_p9, %p1295_p8 }
  0x1b   :  { %1303 = shalt.err (!%p1300_p10)
}
  0x1c   :  { %s1304_s1 = scalar_lea.vmem %s56_s8, 1024  ;;  %p1309_p12 = scmp.lt.s32.totalorder %s56_s8, %s56_s8 }
  0x1d   :  { %p1305_p11 = scmp.ne.s32.totalorder %s56_s8, %s1304_s1  ;;  %p1310_p13 = scmp.lt.s32.totalorder %s1304_s1, %s1304_s1 }
  0x1f   :  { %p1311_p0 = por %p1310_p13, %p1309_p12 }
  0x21   :  { %p1312_p1 = pnand %p1311_p0, %p1305_p11 }
  0x23   :  { %1315 = shalt.err (!%p1312_p1)
}
  0x24   :  { %61 = dma.hbm_to_vmem [thread:$0]  %s1658_s3, 1024, %s56_s8, [#allocation10], %s1413_s28, %s1413_s28, %s1414_s29  }
  0x25   :  { %s1316_s22 = scalar_lea.hbm %s1655_s0, 512 }
  0x26   :  { %p1317_p2 = scmp.ne.s32.totalorder %s1655_s0, %s1316_s22  ;;  %p1320_p3 = scmp.lt.u32.totalorder %s1316_s22, %s1655_s0 }
  0x28   :  { %p1322_p4 = pnand %p1320_p3, %p1317_p2 }
  0x2a   :  { %1325 = shalt.err (!%p1322_p4)
}
  0x2b   :  { %s1326_s27 = scalar_lea.vmem %s20_s10, 512  ;;  %p1331_p6 = scmp.lt.s32.totalorder %s20_s10, %s20_s10 }
  0x2c   :  { %p1327_p5 = scmp.ne.s32.totalorder %s20_s10, %s1326_s27  ;;  %p1332_p7 = scmp.lt.s32.totalorder %s1326_s27, %s1326_s27 }
  0x2e   :  { %p1333_p8 = por %p1332_p7, %p1331_p6 }
  0x30   :  { %p1334_p9 = pnand %p1333_p8, %p1327_p5 }
  0x32   :  { %1337 = shalt.err (!%p1334_p9)
}
  0x33   :  { %s1417_s3 = smov 128   ;;  %s1418_s30 = smov 8  }
  0x34   :  { %25 = dma.hbm_to_vmem [thread:$0]  %s1655_s0, 512, %s20_s10, [#allocation4], %s1417_s3, %s1417_s3, %s1418_s30  }
  0x35   :  { %s1419_s8 = smov [#allocation8]   ;;  %s1420_s11 = smov [#allocation11]  }
  0x36   :  { %s43_s9 = sshll.u32 %s1419_s8, 4  ;;  %s67_s12 = sshll.u32 %s1420_s11, 4  ;;  %s44_s9 = int_to_ptr.vmem [resolvable:$true] %s43_s9  ;;  %s68_s12 = int_to_ptr.vmem [resolvable:$true] %s67_s12 }
  0x37   :  { %s1338_s15 = scalar_lea.hbm %s1657_s2, 1024 }
  0x38   :  { %p1339_p10 = scmp.ne.s32.totalorder %s1657_s2, %s1338_s15  ;;  %p1342_p11 = scmp.lt.u32.totalorder %s1338_s15, %s1657_s2 }
  0x3a   :  { %p1344_p12 = pnand %p1342_p11, %p1339_p10 }
  0x3c   :  { %1347 = shalt.err (!%p1344_p12)
}
  0x3d   :  { %s1348_s0 = scalar_lea.vmem %s44_s9, 1024  ;;  %p1353_p0 = scmp.lt.s32.totalorder %s44_s9, %s44_s9 }
  0x3e   :  { %p1349_p13 = scmp.ne.s32.totalorder %s44_s9, %s1348_s0  ;;  %p1354_p1 = scmp.lt.s32.totalorder %s1348_s0, %s1348_s0 }
  0x40   :  { %p1355_p2 = por %p1354_p1, %p1353_p0 }
  0x42   :  { %p1356_p3 = pnand %p1355_p2, %p1349_p13 }
  0x44   :  { %1359 = shalt.err (!%p1356_p3)
}
  0x45   :  { %49 = dma.hbm_to_vmem [thread:$0]  %s1657_s2, 1024, %s44_s9, [#allocation7], %s1413_s28, %s1413_s28, %s1414_s29  }
  0x46   :  { %s1360_s22 = scalar_lea.hbm %s1659_s4, 1024 }
  0x47   :  { %p1361_p4 = scmp.ne.s32.totalorder %s1659_s4, %s1360_s22  ;;  %p1364_p5 = scmp.lt.u32.totalorder %s1360_s22, %s1659_s4 }
  0x49   :  { %p1366_p6 = pnand %p1364_p5, %p1361_p4 }
  0x4b   :  { %1369 = shalt.err (!%p1366_p6)
}
  0x4c   :  { %s1370_s27 = scalar_lea.vmem %s68_s12, 1024  ;;  %p1375_p8 = scmp.lt.s32.totalorder %s68_s12, %s68_s12 }
  0x4d   :  { %p1371_p7 = scmp.ne.s32.totalorder %s68_s12, %s1370_s27  ;;  %p1376_p9 = scmp.lt.s32.totalorder %s1370_s27, %s1370_s27 }
  0x4f   :  { %p1377_p10 = por %p1376_p9, %p1375_p8 }
  0x51   :  { %p1378_p11 = pnand %p1377_p10, %p1371_p7 }
  0x53   :  { %1381 = shalt.err (!%p1378_p11)
}
  0x54   :  { %73 = dma.hbm_to_vmem [thread:$0]  %s1659_s4, 1024, %s68_s12, [#allocation10], %s1413_s28, %s1413_s28, %s1414_s29  }
  0x55   :  { %1404 = dma.done.wait [#allocation4], 512  }
  0x56   :  { %1405 = vsyncadd [#allocation4], 4294966784 }
  0x57   :  { %1406 = dma.done.wait [#allocation7], 2048  }
  0x58   :  { %1407 = vsyncadd [#allocation7], 4294965248 }
  0x59   :  { %1408 = dma.done.wait [#allocation10], 2048  }
  0x5a   :  { %1409 = vsyncadd [#allocation10], 4294965248  ;;  %v1208_v0 = vld [vmem:[#allocation8] sm:$0xff]   ;;  %v1209_v1 = vld [vmem:[#allocation8 + $0x8] sm:$0xff]   ;;  %v1421_v36 = vmov 32   ;;  %s1422_s4 = smov [#allocation12]  }
  0x5b   :  { %1051 = vmatprep.subr.bf16.mxu1 %v1208_v0  ;;  %v1210_v2 = vld [vmem:[#allocation8 + $0x10] sm:$0xff]   ;;  %v1216_v3 = vld [vmem:[#allocation9] sm:$0xff]   ;;  %v1211_v4 = vld [vmem:[#allocation8 + $0x18] sm:$0xff]   ;;  %1207 = vset.pattern.permute.xlu1 %v1421_v36  ;;  %s957_s28 = sshll.u32 %s1422_s4, 4  ;;  %s958_s28 = int_to_ptr.vmem [resolvable:$true] %s957_s28 }
  0x5c   :  { %1052 = vmatpush3.bf16.xpose.msra.mxu1 %v1208_v0  ;;  %1067 = vmatprep.mubr.bf16.mxu1 %v1216_v3  ;;  %v1212_v5 = vld [vmem:[#allocation8 + $0x20] sm:$0xff]   ;;  %v1213_v6 = vld [vmem:[#allocation8 + $0x28] sm:$0xff]   ;;  %v1214_v7 = vld [vmem:[#allocation8 + $0x30] sm:$0xff]   ;;  %s1382_s29 = scalar_lea.vmem %s958_s28, 2048  ;;  %p1387_p13 = scmp.lt.s32.totalorder %s958_s28, %s958_s28 }
  0x5d   :  { %1053 = vmatprep.subr.bf16.mxu1 %v1209_v1  ;;  %v1215_v8 = vld [vmem:[#allocation8 + $0x38] sm:$0xff]   ;;  %v1218_v9 = vld [vmem:[#allocation6] sm:$0xff]   ;;  %v1217_v10 = vld [vmem:[#allocation9 + $0x8] sm:$0xff]   ;;  %1206 = vset.pattern.permute.xlu0 %v1421_v36  ;;  %p1383_p12 = scmp.ne.s32.totalorder %s958_s28, %s1382_s29  ;;  %p1388_p0 = scmp.lt.s32.totalorder %s1382_s29, %s1382_s29 }
  0x5e   :  { %v1220_v11 = vld [vmem:[#allocation9 + $0x10] sm:$0xff]   ;;  %v1219_v12 = vld [vmem:[#allocation6 + $0x8] sm:$0xff]   ;;  %v1221_v14 = vld [vmem:[#allocation9 + $0x18] sm:$0xff]  }
  0x5f   :  { %v1222_v13 = vld [vmem:[#allocation6 + $0x10] sm:$0xff]   ;;  %v1224_v15 = vld [vmem:[#allocation9 + $0x20] sm:$0xff]   ;;  %v1223_v16 = vld [vmem:[#allocation6 + $0x18] sm:$0xff]   ;;  %p1389_p1 = por %p1388_p0, %p1387_p13 }
  0x60   :  { %v1226_v17 = vld [vmem:[#allocation6 + $0x20] sm:$0xff]   ;;  %v1225_v18 = vld [vmem:[#allocation9 + $0x28] sm:$0xff]   ;;  %v1228_v19 = vld [vmem:[#allocation9 + $0x30] sm:$0xff]  }
  0x61   :  { %v1227_v20 = vld [vmem:[#allocation6 + $0x28] sm:$0xff]   ;;  %v1230_v21 = vld [vmem:[#allocation6 + $0x30] sm:$0xff]   ;;  %v351_v22 = vld [vmem:[#allocation3] sm:$0xff]  ;;  %p1390_p2 = pnand %p1389_p1, %p1383_p12 }
  0x62   :  { %v1229_v23 = vld [vmem:[#allocation9 + $0x38] sm:$0xff]   ;;  %v355_v24 = vunpack.c.l.s8.bf16 %v351_v22  ;;  %v352_v26 = vld [vmem:[#allocation3 + $0x8] sm:$0xff]  ;;  %v356_v27 = vunpack.c.h.s8.bf16 %v351_v22  ;;  %v353_v29 = vld [vmem:[#allocation3 + $0x10] sm:$0xff] }
  0x63   :  { %v1231_v25 = vld [vmem:[#allocation6 + $0x38] sm:$0xff]   ;;  %v357_v28 = vunpack.c.l.s8.bf16 %v352_v26  ;;  %v358_v30 = vunpack.c.h.s8.bf16 %v352_v26  ;;  %v359_v31 = vunpack.c.l.s8.bf16 %v353_v29  ;;  %v360_v33 = vunpack.c.h.s8.bf16 %v353_v29 }
  0x64   :  { %1054 = vmatpush3.bf16.xpose.msra.mxu1 %v1209_v1  ;;  %v354_v32 = vld [vmem:[#allocation3 + $0x18] sm:$0xff] }
  0x65   :  { %1055 = vmatprep.subr.bf16.mxu1 %v1210_v2  ;;  %v361_v34 = vunpack.c.l.s8.bf16 %v354_v32  ;;  %v362_v35 = vunpack.c.h.s8.bf16 %v354_v32 }
  0x6c   :  { %1056 = vmatpush3.bf16.xpose.msra.mxu1 %v1210_v2 }
  0x6d   :  { %1057 = vmatprep.subr.bf16.mxu1 %v1211_v4 }
  0x74   :  { %1058 = vmatpush3.bf16.xpose.msra.mxu1 %v1211_v4 }
  0x75   :  { %1059 = vmatprep.subr.bf16.mxu1 %v1212_v5 }
  0x7c   :  { %1060 = vmatpush3.bf16.xpose.msra.mxu1 %v1212_v5 }
  0x7d   :  { %1061 = vmatprep.subr.bf16.mxu1 %v1213_v6 }
  0x84   :  { %1062 = vmatpush3.bf16.xpose.msra.mxu1 %v1213_v6 }
  0x85   :  { %1063 = vmatprep.subr.bf16.mxu1 %v1214_v7 }
  0x8c   :  { %1064 = vmatpush3.bf16.xpose.msra.mxu1 %v1214_v7 }
  0x8d   :  { %1065 = vmatprep.subr.bf16.mxu1 %v1215_v8 }
  0x94   :  { %1066 = vmatpush3.bf16.xpose.msra.mxu1 %v1215_v8 }
  0x95   :  { %1083 = vmatprep.subr.bf16.mxu1 %v1218_v9 }
  0x9b   :  { %1068 = vmatmul.mubr.bf16.vlgmr.msra.gmra.mrb[0].mxu1 %v1217_v10 }
  0x9c   :  { %1084 = vmatpush3.bf16.msra.mxu1 %v1218_v9  ;;  %1071 = vmatprep.mubr.bf16.mxu1 %v1220_v11 }
  0x9d   :  { %1085 = vmatprep.subr.bf16.mxu1 %v1219_v12 }
  0xa0   :  { %1086 = vmatpush3.bf16.msra.mxu1 %v1219_v12 }
  0xa1   :  { %1087 = vmatprep.subr.bf16.mxu1 %v1222_v13 }
  0xa3   :  { %1072 = vmatmul.mubr.bf16.gmra.mrb[4].mxu1 %v1221_v14 }
  0xa4   :  { %1088 = vmatpush3.bf16.msra.mxu1 %v1222_v13  ;;  %1075 = vmatprep.mubr.bf16.mxu1 %v1224_v15 }
  0xa5   :  { %1089 = vmatprep.subr.bf16.mxu1 %v1223_v16 }
  0xa8   :  { %1090 = vmatpush3.bf16.msra.mxu1 %v1223_v16 }
  0xa9   :  { %1091 = vmatprep.subr.bf16.mxu1 %v1226_v17 }
  0xab   :  { %1076 = vmatmul.mubr.bf16.gmra.mrb[8].mxu1 %v1225_v18 }
  0xac   :  { %1092 = vmatpush3.bf16.msra.mxu1 %v1226_v17  ;;  %1079 = vmatprep.mubr.bf16.mxu1 %v1228_v19 }
  0xad   :  { %1093 = vmatprep.subr.bf16.mxu1 %v1227_v20 }
  0xb0   :  { %1094 = vmatpush3.bf16.msra.mxu1 %v1227_v20 }
  0xb1   :  { %1095 = vmatprep.subr.bf16.mxu1 %v1230_v21 }
  0xb3   :  { %1080 = vmatmul.mubr.bf16.gmra.mrb[12].mxu1 %v1229_v23 }
  0xb4   :  { %1096 = vmatpush3.bf16.msra.mxu1 %v1230_v21  ;;  %1099 = vmatprep.mubr.bf16.mxu1 %v355_v24 }
  0xb5   :  { %1097 = vmatprep.subr.bf16.mxu1 %v1231_v25 }
  0xb8   :  { %1098 = vmatpush3.bf16.msra.mxu1 %v1231_v25 }
  0xbb   :  { %1100 = vmatmul.mubr.bf16.vlgmr.msra.gmra.mrb[16].mxu1 %v356_v27 }
  0xbc   :  { %1103 = vmatprep.mubr.bf16.mxu1 %v357_v28 }
  0xc3   :  { %1104 = vmatmul.mubr.bf16.gmra.mrb[20].mxu1 %v358_v30 }
  0xc4   :  { %1107 = vmatprep.mubr.bf16.mxu1 %v359_v31 }
  0xcb   :  { %1108 = vmatmul.mubr.bf16.gmra.mrb[24].mxu1 %v360_v33 }
  0xcc   :  { %1111 = vmatprep.mubr.bf16.mxu1 %v361_v34 }
  0xd3   :  { %1112 = vmatmul.mubr.bf16.gmra.mrb[28].mxu1 %v362_v35 }
 0x16e   :  { %v1528_v37 = vpop.f32.mrb[0].mxu1 }
 0x16f   :  { %v1530_v38 = vpop.f32.mrb[1].mxu1 }
 0x170   :  { %v1532_v39 = vpop.f32.mrb[2].mxu1 }
 0x171   :  { %v1534_v40 = vpop.f32.mrb[3].mxu1 }
 0x176   :  { %v1536_v41 = vpop.f32.mrb[4].mxu1 }
 0x177   :  { %v1538_v42 = vpop.f32.mrb[5].mxu1 }
 0x178   :  { %v1540_v43 = vpop.f32.mrb[6].mxu1 }
 0x179   :  { %v1542_v44 = vpop.f32.mrb[7].mxu1 }
 0x17e   :  { %v1544_v45 = vpop.f32.mrb[8].mxu1 }
 0x17f   :  { %v1546_v46 = vpop.f32.mrb[9].mxu1 }
 0x180   :  { %v1548_v47 = vpop.f32.mrb[10].mxu1 }
 0x181   :  { %v1550_v48 = vpop.f32.mrb[11].mxu1 }
 0x186   :  { %v1552_v49 = vpop.f32.mrb[12].mxu1 }
 0x187   :  { %v1554_v50 = vpop.f32.mrb[13].mxu1 }
 0x188   :  { %v1556_v51 = vpop.f32.mrb[14].mxu1 }
 0x189   :  { %v1558_v52 = vpop.f32.mrb[15].mxu1 }
 0x18e   :  { %v1560_v53 = vpop.f32.mrb[16].mxu1 }
 0x18f   :  { %v593_v54 = vmax.f32 %v1560_v53, 1.0  ;;  %v1563_v55 = vpop.f32.mrb[17].mxu1 }
 0x190   :  { %v591_v56 = vmax.f32 %v1563_v55, 1.0  ;;  %v1566_v57 = vpop.f32.mrb[18].mxu1 }
 0x191   :  { %1240 = vrcp.f32 %v593_v54  ;;  %v594_v58 = vmax.f32 %v1566_v57, 1.0  ;;  %v1569_v59 = vpop.f32.mrb[19].mxu1  ;;  %v1232_v54 = vld [vmem:[#allocation11] sm:$0xff]  }
 0x192   :  { %1242 = vrcp.f32 %v591_v56  ;;  %v592_v60 = vmax.f32 %v1569_v59, 1.0  ;;  %1131 = vmatprep.mubr.bf16.mxu0 %v1232_v54 }
 0x193   :  { %1244 = vrcp.f32 %v594_v58 }
 0x194   :  { %1246 = vrcp.f32 %v592_v60 }
 0x196   :  { %v1572_v61 = vpop.f32.mrb[20].mxu1 }
 0x197   :  { %v597_v62 = vmax.f32 %v1572_v61, 1.0  ;;  %v1575_v63 = vpop.f32.mrb[21].mxu1 }
 0x198   :  { %v595_v0 = vmax.f32 %v1575_v63, 1.0  ;;  %v1578_v1 = vpop.f32.mrb[22].mxu1 }
 0x199   :  { %v1580_v2 = vpop.f32.mrb[23].mxu1  ;;  %v598_v3 = vmax.f32 %v1578_v1, 1.0 }
 0x19a   :  { %1248 = vrcp.f32 %v595_v0  ;;  %v596_v4 = vmax.f32 %v1580_v2, 1.0 }
 0x19b   :  { %v1241_v5 = vpop.eup %1240  ;;  %1250 = vrcp.f32 %v597_v62 }
 0x19c   :  { %v1243_v6 = vpop.eup %1242  ;;  %1252 = vrcp.f32 %v596_v4  ;;  %635 = vperm.xlu1 %1207, %v1241_v5  }
 0x19d   :  { %625 = vperm.xlu0 %1206, %v1243_v6   ;;  %1254 = vrcp.f32 %v598_v3  ;;  %v1245_v8 = vpop.eup %1244 }
 0x19e   :  { %v1584_v7 = vpop.f32.mrb[24].mxu1  ;;  %v1247_v11 = vpop.eup %1246 }
 0x19f   :  { %v601_v9 = vmax.f32 %v1584_v7, 1.0  ;;  %v1587_v10 = vpop.f32.mrb[25].mxu1 }
 0x1a0   :  { %v599_v12 = vmax.f32 %v1587_v10, 1.0  ;;  %640 = vperm.xlu1 %1207, %v1245_v8   ;;  %v1590_v13 = vpop.f32.mrb[26].mxu1 }
 0x1a1   :  { %630 = vperm.xlu0 %1206, %v1247_v11   ;;  %v1592_v14 = vpop.f32.mrb[27].mxu1  ;;  %v602_v15 = vmax.f32 %v1590_v13, 1.0 }
 0x1a2   :  { %1256 = vrcp.f32 %v599_v12  ;;  %v600_v16 = vmax.f32 %v1592_v14, 1.0 }
 0x1a3   :  { %1258 = vrcp.f32 %v601_v9 }
 0x1a4   :  { %v1249_v17 = vpop.eup %1248  ;;  %1260 = vrcp.f32 %v600_v16 }
 0x1a5   :  { %v1251_v18 = vpop.eup %1250  ;;  %645 = vperm.xlu0 %1206, %v1249_v17   ;;  %1262 = vrcp.f32 %v602_v15 }
 0x1a6   :  { %v1253_v19 = vpop.eup %1252  ;;  %v1596_v20 = vpop.f32.mrb[28].mxu1 }
 0x1a7   :  { %v605_v21 = vmax.f32 %v1596_v20, 1.0  ;;  %650 = vperm.xlu1 %1207, %v1253_v19   ;;  %v1599_v22 = vpop.f32.mrb[29].mxu1  ;;  %v1255_v23 = vpop.eup %1254 }
 0x1a8   :  { %v603_v24 = vmax.f32 %v1599_v22, 1.0  ;;  %v1602_v25 = vpop.f32.mrb[30].mxu1 }
 0x1a9   :  { %655 = vperm.xlu0 %1206, %v1251_v18   ;;  %v1604_v26 = vpop.f32.mrb[31].mxu1  ;;  %v606_v27 = vmax.f32 %v1602_v25, 1.0 }
 0x1aa   :  { %1264 = vrcp.f32 %v603_v24  ;;  %v604_v28 = vmax.f32 %v1604_v26, 1.0 }
 0x1ab   :  { %1266 = vrcp.f32 %v605_v21  ;;  %660 = vperm.xlu1 %1207, %v1255_v23  }
 0x1ac   :  { %v1257_v29 = vpop.eup %1256  ;;  %1268 = vrcp.f32 %v604_v28 }
 0x1ad   :  { %v1259_v30 = vpop.eup %1258  ;;  %665 = vperm.xlu0 %1206, %v1257_v29   ;;  %1270 = vrcp.f32 %v606_v27 }
 0x1ae   :  { %v1261_v31 = vpop.eup %1260 }
 0x1af   :  { %670 = vperm.xlu1 %1207, %v1261_v31   ;;  %v1263_v32 = vpop.eup %1262 }
 0x1b1   :  { %675 = vperm.xlu0 %1206, %v1259_v30  }
 0x1b3   :  { %680 = vperm.xlu1 %1207, %v1263_v32  }
 0x1b4   :  { %v1265_v33 = vpop.eup %1264 }
 0x1b5   :  { %v1267_v34 = vpop.eup %1266  ;;  %685 = vperm.xlu0 %1206, %v1265_v33  }
 0x1b6   :  { %v1269_v35 = vpop.eup %1268 }
 0x1b7   :  { %690 = vperm.xlu1 %1207, %v1269_v35   ;;  %v1271_v36 = vpop.eup %1270 }
 0x1b9   :  { %695 = vperm.xlu0 %1206, %v1267_v34  }
 0x1bb   :  { %700 = vperm.xlu1 %1207, %v1271_v36   ;;  %v1239_v36 = vld [vmem:[#allocation11 + $0x38] sm:$0xff]  }
 0x21b   :  { %v636_v56 = vpop.permute.xlu1 %635 }
 0x21c   :  { %v626_v58 = vpop.permute.xlu0 %625  ;;  %v705_v62 = vmul.f32 %v1560_v53, %v636_v56 }
 0x21d   :  { %v703_v4 = vmul.f32 %v626_v58, %v1563_v55 }
 0x21f   :  { %v641_v60 = vpop.permute.xlu1 %640 }
 0x220   :  { %v706_v0 = vmul.f32 %v1566_v57, %v641_v60  ;;  %v631_v3 = vpop.permute.xlu0 %630 }
 0x221   :  { %v704_v5 = vmul.f32 %v631_v3, %v1569_v59 }
 0x222   :  { %v720_v6 = vpack.c.bf16 %v706_v0, %v705_v62 }
 0x223   :  { %v719_v8 = vpack.c.bf16 %v704_v5, %v703_v4 }
 0x224   :  { %v646_v9 = vpop.permute.xlu0 %645 }
 0x225   :  { %1115 = vmatprep.subr.bf16.mxu0 %v719_v8  ;;  %v707_v12 = vmul.f32 %v646_v9, %v1575_v63 }
 0x226   :  { %1116 = vmatpush3.bf16.xpose.msra.mxu0 %v719_v8  ;;  %v651_v11 = vpop.permute.xlu1 %650 }
 0x227   :  { %v708_v15 = vmul.f32 %v651_v11, %v1580_v2  ;;  %1117 = vmatprep.subr.bf16.mxu0 %v720_v6 }
 0x228   :  { %v656_v16 = vpop.permute.xlu0 %655 }
 0x229   :  { %v721_v53 = vpack.c.bf16 %v708_v15, %v707_v12  ;;  %v709_v57 = vmul.f32 %v1572_v61, %v656_v16 }
 0x22a   :  { %v661_v17 = vpop.permute.xlu1 %660 }
 0x22b   :  { %v710_v55 = vmul.f32 %v1578_v1, %v661_v17 }
 0x22c   :  { %v666_v18 = vpop.permute.xlu0 %665 }
 0x22d   :  { %v722_v59 = vpack.c.bf16 %v710_v55, %v709_v57  ;;  %v711_v21 = vmul.f32 %v666_v18, %v1587_v10 }
 0x22e   :  { %1118 = vmatpush3.bf16.xpose.msra.mxu0 %v720_v6  ;;  %v671_v19 = vpop.permute.xlu1 %670 }
 0x22f   :  { %v712_v23 = vmul.f32 %v671_v19, %v1592_v14  ;;  %1119 = vmatprep.subr.bf16.mxu0 %v721_v53 }
 0x230   :  { %v676_v63 = vpop.permute.xlu0 %675 }
 0x231   :  { %v723_v24 = vpack.c.bf16 %v712_v23, %v711_v21  ;;  %v713_v27 = vmul.f32 %v1584_v7, %v676_v63  ;;  %v1233_v7 = vld [vmem:[#allocation11 + $0x8] sm:$0xff]  }
 0x232   :  { %v681_v2 = vpop.permute.xlu1 %680 }
 0x233   :  { %v714_v28 = vmul.f32 %v1590_v13, %v681_v2  ;;  %v1234_v13 = vld [vmem:[#allocation11 + $0x10] sm:$0xff]  }
 0x234   :  { %v686_v29 = vpop.permute.xlu0 %685 }
 0x235   :  { %v724_v61 = vpack.c.bf16 %v714_v28, %v713_v27  ;;  %v715_v30 = vmul.f32 %v686_v29, %v1599_v22  ;;  %v1235_v22 = vld [vmem:[#allocation11 + $0x18] sm:$0xff]  }
 0x236   :  { %1120 = vmatpush3.bf16.xpose.msra.mxu0 %v721_v53  ;;  %v691_v1 = vpop.permute.xlu1 %690 }
 0x237   :  { %v716_v31 = vmul.f32 %v691_v1, %v1604_v26  ;;  %1121 = vmatprep.subr.bf16.mxu0 %v722_v59  ;;  %v1236_v26 = vld [vmem:[#allocation11 + $0x20] sm:$0xff]  }
 0x238   :  { %v696_v10 = vpop.permute.xlu0 %695 }
 0x239   :  { %v725_v32 = vpack.c.bf16 %v716_v31, %v715_v30  ;;  %v717_v33 = vmul.f32 %v1596_v20, %v696_v10  ;;  %v1237_v20 = vld [vmem:[#allocation11 + $0x28] sm:$0xff]  }
 0x23a   :  { %v701_v14 = vpop.permute.xlu1 %700 }
 0x23b   :  { %v718_v34 = vmul.f32 %v1602_v25, %v701_v14  ;;  %v1238_v25 = vld [vmem:[#allocation11 + $0x30] sm:$0xff]  }
 0x23d   :  { %v726_v35 = vpack.c.bf16 %v718_v34, %v717_v33 }
 0x23e   :  { %1122 = vmatpush3.bf16.xpose.msra.mxu0 %v722_v59 }
 0x23f   :  { %1123 = vmatprep.subr.bf16.mxu0 %v723_v24 }
 0x246   :  { %1124 = vmatpush3.bf16.xpose.msra.mxu0 %v723_v24 }
 0x247   :  { %1125 = vmatprep.subr.bf16.mxu0 %v724_v61 }
 0x24e   :  { %1126 = vmatpush3.bf16.xpose.msra.mxu0 %v724_v61 }
 0x24f   :  { %1127 = vmatprep.subr.bf16.mxu0 %v725_v32 }
 0x256   :  { %1128 = vmatpush3.bf16.xpose.msra.mxu0 %v725_v32 }
 0x257   :  { %1129 = vmatprep.subr.bf16.mxu0 %v726_v35 }
 0x25e   :  { %1130 = vmatpush3.bf16.xpose.msra.mxu0 %v726_v35 }
 0x265   :  { %1132 = vmatmul.mubr.bf16.vlgmr.msra.gmra.mrb[0].mxu0 %v1233_v7 }
 0x266   :  { %1135 = vmatprep.mubr.bf16.mxu0 %v1234_v13 }
 0x26d   :  { %1136 = vmatmul.mubr.bf16.gmra.mrb[4].mxu0 %v1235_v22 }
 0x26e   :  { %1139 = vmatprep.mubr.bf16.mxu0 %v1236_v26 }
 0x275   :  { %1140 = vmatmul.mubr.bf16.gmra.mrb[8].mxu0 %v1237_v20 }
 0x276   :  { %1143 = vmatprep.mubr.bf16.mxu0 %v1238_v25 }
 0x27d   :  { %1144 = vmatmul.mubr.bf16.gmra.mrb[12].mxu0 %v1239_v36 }
 0x338   :  { %v1133_v54 = vpop.f32.mrb[0].mxu0 }
 0x339   :  { %v1149_v56 = vadd.f32 %v1133_v54, %v1528_v37  ;;  %v841_v58 = vpop.f32.mrb[1].mxu0 }
 0x33a   :  { %v1152_v60 = vadd.f32 %v841_v58, %v1530_v38  ;;  %v1134_v62 = vpop.f32.mrb[2].mxu0 }
 0x33b   :  { %v922_v0 = vmax.f32 %v1149_v56, 0.0  ;;  %v1155_v3 = vadd.f32 %v1134_v62, %v1532_v39  ;;  %v844_v4 = vpop.f32.mrb[3].mxu0 }
 0x33c   :  { %v920_v5 = vmax.f32 %v1152_v60, 0.0  ;;  %v1158_v6 = vadd.f32 %v844_v4, %v1534_v40 }
 0x33d   :  { %938 = vst [vmem:[#allocation12 + $0x10] sm:$0xff] %v922_v0  ;;  %v923_v8 = vmax.f32 %v1155_v3, 0.0 }
 0x33e   :  { %936 = vst [vmem:[#allocation12] sm:$0xff] %v920_v5  ;;  %v921_v9 = vmax.f32 %v1158_v6, 0.0 }
 0x33f   :  { %939 = vst [vmem:[#allocation12 + $0x18] sm:$0xff] %v923_v8 }
 0x340   :  { %937 = vst [vmem:[#allocation12 + $0x8] sm:$0xff] %v921_v9  ;;  %v1137_v11 = vpop.f32.mrb[4].mxu0 }
 0x341   :  { %v1161_v37 = vadd.f32 %v1137_v11, %v1536_v41  ;;  %v857_v12 = vpop.f32.mrb[5].mxu0 }
 0x342   :  { %v1164_v38 = vadd.f32 %v857_v12, %v1538_v42  ;;  %v1138_v15 = vpop.f32.mrb[6].mxu0 }
 0x343   :  { %v926_v16 = vmax.f32 %v1161_v37, 0.0  ;;  %v1167_v39 = vadd.f32 %v1138_v15, %v1540_v43  ;;  %v860_v53 = vpop.f32.mrb[7].mxu0 }
 0x344   :  { %v924_v17 = vmax.f32 %v1164_v38, 0.0  ;;  %v1170_v40 = vadd.f32 %v860_v53, %v1542_v44 }
 0x345   :  { %942 = vst [vmem:[#allocation12 + $0x30] sm:$0xff] %v926_v16  ;;  %v927_v57 = vmax.f32 %v1167_v39, 0.0 }
 0x346   :  { %940 = vst [vmem:[#allocation12 + $0x20] sm:$0xff] %v924_v17  ;;  %v925_v55 = vmax.f32 %v1170_v40, 0.0 }
 0x347   :  { %943 = vst [vmem:[#allocation12 + $0x38] sm:$0xff] %v927_v57 }
 0x348   :  { %941 = vst [vmem:[#allocation12 + $0x28] sm:$0xff] %v925_v55  ;;  %v1141_v18 = vpop.f32.mrb[8].mxu0 }
 0x349   :  { %v1173_v41 = vadd.f32 %v1141_v18, %v1544_v45  ;;  %v873_v59 = vpop.f32.mrb[9].mxu0 }
 0x34a   :  { %v1176_v42 = vadd.f32 %v873_v59, %v1546_v46  ;;  %v1142_v19 = vpop.f32.mrb[10].mxu0 }
 0x34b   :  { %v930_v21 = vmax.f32 %v1173_v41, 0.0  ;;  %v1179_v43 = vadd.f32 %v1142_v19, %v1548_v47  ;;  %v876_v23 = vpop.f32.mrb[11].mxu0 }
 0x34c   :  { %v928_v63 = vmax.f32 %v1176_v42, 0.0  ;;  %v1182_v44 = vadd.f32 %v876_v23, %v1550_v48 }
 0x34d   :  { %946 = vst [vmem:[#allocation12 + $0x50] sm:$0xff] %v930_v21  ;;  %v931_v24 = vmax.f32 %v1179_v43, 0.0 }
 0x34e   :  { %944 = vst [vmem:[#allocation12 + $0x40] sm:$0xff] %v928_v63  ;;  %v929_v2 = vmax.f32 %v1182_v44, 0.0 }
 0x34f   :  { %947 = vst [vmem:[#allocation12 + $0x58] sm:$0xff] %v931_v24 }
 0x350   :  { %945 = vst [vmem:[#allocation12 + $0x48] sm:$0xff] %v929_v2  ;;  %v1145_v27 = vpop.f32.mrb[12].mxu0 }
 0x351   :  { %v1185_v45 = vadd.f32 %v1145_v27, %v1552_v49  ;;  %v889_v28 = vpop.f32.mrb[13].mxu0 }
 0x352   :  { %v1188_v46 = vadd.f32 %v889_v28, %v1554_v50  ;;  %v1146_v29 = vpop.f32.mrb[14].mxu0 }
 0x353   :  { %v934_v61 = vmax.f32 %v1185_v45, 0.0  ;;  %v1191_v47 = vadd.f32 %v1146_v29, %v1556_v51  ;;  %v892_v1 = vpop.f32.mrb[15].mxu0 }
 0x354   :  { %v932_v48 = vmax.f32 %v1188_v46, 0.0  ;;  %v1194_v30 = vadd.f32 %v892_v1, %v1558_v52 }
 0x355   :  { %950 = vst [vmem:[#allocation12 + $0x70] sm:$0xff] %v934_v61  ;;  %v935_v31 = vmax.f32 %v1191_v47, 0.0 }
 0x356   :  { %948 = vst [vmem:[#allocation12 + $0x60] sm:$0xff] %v932_v48  ;;  %v933_v10 = vmax.f32 %v1194_v30, 0.0 }
 0x357   :  { %951 = vst [vmem:[#allocation12 + $0x78] sm:$0xff] %v935_v31 }
 0x358   :  { %949 = vst [vmem:[#allocation12 + $0x68] sm:$0xff] %v933_v10 }
 0x359   :  { %1393 = shalt.err (!%p1390_p2)
}
 0x35a   :  { %s1394_s9 = scalar_lea.hbm %s1660_s5, 2048 }
 0x35b   :  { %p1395_p3 = scmp.ne.s32.totalorder %s1660_s5, %s1394_s9  ;;  %p1398_p4 = scmp.lt.u32.totalorder %s1394_s9, %s1660_s5 }
 0x35d   :  { %p1400_p5 = pnand %p1398_p4, %p1395_p3 }
 0x35f   :  { %1403 = shalt.err (!%p1400_p5)
}
 0x360   :  { %963 = dma.vmem_to_hbm [thread:$0]  %s958_s28, 2048, %s1660_s5, [#allocation5], %s1417_s3, %s1417_s3, %s1418_s30  }
 0x361   :  { %1410 = dma.done.wait [#allocation5], 2048  }
 0x362   :  { %1411 = vsyncadd [#allocation5], 4294965248 }
 0x363   :  { %967 = vsyncpa [#allocation4], 1 }
 0x364   :  { %968 = vsyncpa [#allocation7], 1 }
 0x365   :  { %969 = vsyncpa [#allocation10], 1 }
 0x366   :  { %970 = vsyncpa [#allocation5], 1 }

</bundles_post_ra>
